<compile_context>
chip_gen: v5e
topology: v5e:2x2
jax: 0.10.0
libtpu: 0.0.40
codegen_flags: <defaults>
</compile_context>

<pallas_src>
import math

import jax
import jax.numpy as jnp
from jax.experimental import pallas as pl
from jax.experimental.pallas import tpu as pltpu

_INV_SQRT2 = 0.7071067811865476
_SQRT_2_OVER_PI = 0.7978845608028654


def _cdiv(a, b):
    return -(-a // b)


def _round_up(v, m):
    return ((v + m - 1) // m) * m


def _chip_info():
    """Best-effort query of per-TensorCore VMEM, MXU width and TC count."""
    vmem_cap = 64 * 1024 * 1024          # conservative default (v7x per-TC)
    mxu_align = 128
    num_tc = 1
    try:
        vmem_cap = int(pltpu.get_tpu_info().vmem_capacity_bytes)
    except Exception:
        pass
    try:
        kind = jax.devices()[0].device_kind.lower()
    except Exception:
        kind = ""
    if "v6" in kind or "v7" in kind:
        mxu_align = 256                  # 2x256^2 MXU
    if "v7" in kind or "v4" in kind or "v5p" in kind or "v5 p" in kind:
        num_tc = 2                       # dual-TC / megacore chips
    return vmem_cap, mxu_align, num_tc


def _make_mlp_kernel(hidden, tk, needs_mask, approximate_gelu):
    """Kernel factory: statics (hidden, tk, mask flag, gelu flavor) are baked in."""

    def kernel(x_ref, w1_ref, b1_ref, w2_ref, b2_ref, o_ref, acc_ref):
        k = pl.program_id(1)

        @pl.when(k == 0)
        def _():
            acc_ref[...] = jnp.zeros_like(acc_ref)

        # First matmul for this hidden tile: (tm, IN) @ (IN, tk) -> f32.
        h = jnp.dot(x_ref[...], w1_ref[...], preferred_element_type=jnp.float32)
        h = h + b1_ref[...].astype(jnp.float32)

        if approximate_gelu:
            # tanh GELU runs on the EUP (its own VLIW slot) instead of a long
            # VPU erf polynomial; opt-in, PyTorch default parity is exact erf.
            h = 0.5 * h * (1.0 + jnp.tanh(_SQRT_2_OVER_PI * (h + 0.044715 * h * h * h)))
        else:
            h = 0.5 * h * (1.0 + jax.lax.erf(h * _INV_SQRT2))

        w2 = w2_ref[...]
        if needs_mask:
            # The last hidden tile overhangs `hidden`: zero the OOB columns of
            # h and the matching (garbage) rows of the W2 tile so neither can
            # pollute the accumulator (jnp.where also kills NaN garbage).
            base = k * tk
            h_ok = (jax.lax.broadcasted_iota(jnp.int32, h.shape, 1) + base) < hidden
            w_ok = (jax.lax.broadcasted_iota(jnp.int32, w2.shape, 0) + base) < hidden
            h = jnp.where(h_ok, h, 0.0)
            w2 = jnp.where(w_ok, w2, jnp.zeros_like(w2))

        # Second matmul, accumulated over hidden tiles: (tm, tk) @ (tk, OUT).
        acc_ref[...] += jnp.dot(h.astype(w2.dtype), w2,
                                preferred_element_type=jnp.float32)

        @pl.when(k == pl.num_programs(1) - 1)
        def _():
            o_ref[...] = (acc_ref[...] + b2_ref[...].astype(jnp.float32)
                          ).astype(o_ref.dtype)

    return kernel


def prepare_mlp_params(w1, b1, w2, b2):
    """One-time prep of PyTorch nn.Linear params: (out,in) -> (in,out) layout.

    Do this ONCE outside the hot path (the transposes materialize HBM copies)
    and pass the result straight to mlp_pallas on every call.
    """
    return jnp.asarray(w1).T, jnp.asarray(b1), jnp.asarray(w2).T, jnp.asarray(b2)


def mlp_pallas(x, w1_t, b1, w2_t, b2, *, row_tile=None, hidden_tile=None,
               weight_buffers=2, approximate_gelu=False):
    """Fused MLP forward: GELU(x @ w1_t + b1) @ w2_t + b2.

    x    : (..., in_features)
    w1_t : (in_features, hidden_features)     -- pre-transposed (see prepare_mlp_params)
    b1   : (hidden_features,)
    w2_t : (hidden_features, out_features)    -- pre-transposed
    b2   : (out_features,)
    weight_buffers > 2 opts into deeper pipelining on the weight streams
    (only useful if a profile shows exposed DMA); gated on the VMEM budget.
    """
    in_features = x.shape[-1]
    hidden = w1_t.shape[1]
    out_features = w2_t.shape[1]
    assert w1_t.shape == (in_features, hidden), "w1_t must be (in, hidden)"
    assert w2_t.shape == (hidden, out_features), "w2_t must be (hidden, out)"
    assert b1.shape[-1] == hidden and b2.shape[-1] == out_features

    lead_shape = x.shape[:-1]
    M = int(math.prod(lead_shape)) if lead_shape else 1
    x2 = x.reshape(M, in_features)

    x_item = jnp.dtype(x2.dtype).itemsize
    w_item = jnp.dtype(w1_t.dtype).itemsize
    o_item = x_item

    vmem_cap, mxu_align, num_tc = _chip_info()
    if row_tile is None:
        row_tile = 512 if mxu_align >= 256 else 256        # v6e/v7x vs v5e
    if hidden_tile is None:
        hidden_tile = 512 if vmem_cap <= 64 * 1024 * 1024 else 1024

    # Lane-dense output path: pad OUT to a 128 multiple (zeros), slice after.
    out_pad = _round_up(max(out_features, 128), 128)
    if out_pad != out_features:
        w2_t = jnp.pad(w2_t, ((0, 0), (0, out_pad - out_features)))
        b2 = jnp.pad(jnp.asarray(b2).reshape(-1), (0, out_pad - out_features))
    b1_r = jnp.asarray(b1).reshape(1, hidden)
    b2_r = jnp.asarray(b2).reshape(1, out_pad)
    IN, OUT = in_features, out_pad

    # ---- row tile (tm): the weight-reuse / arithmetic-intensity lever ------
    sub = {4: 8, 2: 16, 1: 32}.get(x_item, 8)               # sublane pack
    M8 = _round_up(M, sub)
    tm = max(sub, _round_up(min(row_tile, M8), sub))
    if tm >= mxu_align:
        tm = (tm // mxu_align) * mxu_align                  # full systolic passes
    nm = _cdiv(M, tm)
    if num_tc > 1 and nm < num_tc and M8 >= num_tc * sub:
        # Keep both TensorCores busy on dual-TC / megacore chips.
        tm_split = _round_up(_cdiv(M, num_tc), sub)
        if tm_split >= mxu_align:
            tm_split = _round_up(tm_split, mxu_align)
        tm = min(tm, max(sub, tm_split))
        nm = _cdiv(M, tm)

    # ---- hidden tile (tk): reduction axis -----------------------------------
    if hidden <= hidden_tile:
        tk = hidden
    else:
        cap = max(128, (hidden_tile // 128) * 128)
        tk = cap
        c = cap
        while c >= 128 and 2 * c >= cap:                    # prefer exact divisor
            if hidden % c == 0:
                tk = c
                break
            c -= 128

    # ---- fit into per-core VMEM (shrink tk first; tm only as last resort) ---
    def _bytes(tm_, tk_):
        per = (tm_ * IN * x_item + IN * tk_ * w_item + tk_ * w_item
               + tk_ * OUT * w_item + OUT * w_item + tm_ * OUT * o_item)
        return 2 * per + tm_ * OUT * 4                      # dbl-buffered + f32 acc

    budget = int(0.85 * vmem_cap)
    while _bytes(tm, tk) > budget and tk > 128:
        tk = max(128, ((tk // 2) // 128) * 128)
    while _bytes(tm, tk) > budget and tm > sub:
        tm = max(sub, ((tm // 2) // sub) * sub)
    nm = _cdiv(M, tm)
    nk = _cdiv(hidden, tk)
    needs_mask = (tk < hidden) and (hidden % tk != 0)

    # Optional deeper buffering on the weight streams only (the only blocks
    # whose index changes every k step); skip if it would blow the budget.
    extra = 0
    if weight_buffers > 2 and nk > 1:
        extra = (weight_buffers - 2) * (IN * tk + tk * OUT) * w_item
        if _bytes(tm, tk) + extra > budget:
            weight_buffers, extra = 2, 0

    # Clamp the VMEM request to the real chip capacity (64 MiB/TC on v7x).
    vmem_limit = min(int(0.9 * vmem_cap),
                     max(32 * 1024 * 1024, int(1.25 * (_bytes(tm, tk) + extra))))

    flops = 2 * M * hidden * (IN + OUT)
    transcendentals = M * hidden                            # one erf/tanh per act
    bytes_accessed = (M * IN * x_item
                      + nm * (IN * hidden + hidden + hidden * OUT + OUT) * w_item
                      + M * OUT * o_item)

    if weight_buffers > 2:
        w1_spec = pl.BlockSpec((IN, tk), lambda i, k: (0, k),
                               pipeline_mode=pl.Buffered(weight_buffers))
        w2_spec = pl.BlockSpec((tk, OUT), lambda i, k: (k, 0),
                               pipeline_mode=pl.Buffered(weight_buffers))
    else:
        w1_spec = pl.BlockSpec((IN, tk), lambda i, k: (0, k))
        w2_spec = pl.BlockSpec((tk, OUT), lambda i, k: (k, 0))

    kernel = _make_mlp_kernel(hidden, tk, needs_mask, approximate_gelu)

    out = pl.pallas_call(
        kernel,
        out_shape=jax.ShapeDtypeStruct((M, OUT), x.dtype),
        grid_spec=pltpu.PrefetchScalarGridSpec(
            num_scalar_prefetch=0,
            grid=(nm, nk),
            in_specs=[
                pl.BlockSpec((tm, IN), lambda i, k: (i, 0)),
                w1_spec,
                pl.BlockSpec((1, tk), lambda i, k: (0, k)),
                w2_spec,
                pl.BlockSpec((1, OUT), lambda i, k: (0, 0)),
            ],
            out_specs=pl.BlockSpec((tm, OUT), lambda i, k: (i, 0)),
            scratch_shapes=[pltpu.VMEM((tm, OUT), jnp.float32)],
        ),
        compiler_params=pltpu.CompilerParams(
            dimension_semantics=("parallel", "arbitrary"),
            vmem_limit_bytes=vmem_limit),
        cost_estimate=pl.CostEstimate(flops=flops,
                                      transcendentals=transcendentals,
                                      bytes_accessed=bytes_accessed),
    )(x2, w1_t, b1_r, w2_t, b2_r)

    if out_pad != out_features:
        out = out[:, :out_features]
    return out.reshape(*lead_shape, out_features)


def mlp_pallas_torch_layout(x, w1, b1, w2, b2, **kwargs):
    """Convenience wrapper taking PyTorch nn.Linear (out, in) weight layout.

    Prefer prepare_mlp_params(...) once + mlp_pallas(...) in hot loops so the
    weight transposes are not re-paid on every call.
    """
    w1_t, b1, w2_t, b2 = prepare_mlp_params(w1, b1, w2, b2)
    return mlp_pallas(x, w1_t, b1, w2_t, b2, **kwargs)


def _mlp_reference(x, w1, b1, w2, b2):
    h = x @ w1.T + b1
    h = 0.5 * h * (1.0 + jax.lax.erf(h * _INV_SQRT2))
    return h @ w2.T + b2


def init_mlp_params(key, in_features, hidden_features, out_features,
                    dtype=jnp.float32):
    """Deterministic init mimicking nn.Linear default (kaiming-uniform-ish)."""
    k1, k2, k3, k4 = jax.random.split(key, 4)
    bound1 = 1.0 / math.sqrt(in_features)
    bound2 = 1.0 / math.sqrt(hidden_features)
    w1 = jax.random.uniform(k1, (hidden_features, in_features),
                            dtype, -bound1, bound1)
    b1 = jax.random.uniform(k2, (hidden_features,), dtype, -bound1, bound1)
    w2 = jax.random.uniform(k3, (out_features, hidden_features),
                            dtype, -bound2, bound2)
    b2 = jax.random.uniform(k4, (out_features,), dtype, -bound2, bound2)
    return w1, b1, w2, b2


if __name__ == "__main__":
    key = jax.random.PRNGKey(0)
    kx, kp, kq = jax.random.split(key, 3)

    # 1) Default path: (B, S, C) channels-last usage, lane-dense dims.
    B, S = 2, 8
    IN1, HID1, OUT1 = 128, 256, 128
    x = jax.random.normal(kx, (B, S, IN1), jnp.float32)
    w1, b1, w2, b2 = init_mlp_params(kp, IN1, HID1, OUT1)
    # Prepare (transpose) weights ONCE outside the hot path.
    w1_t, b1p, w2_t, b2p = prepare_mlp_params(w1, b1, w2, b2)
    y = jax.block_until_ready(mlp_pallas(x, w1_t, b1p, w2_t, b2p))
    y_ref = _mlp_reference(x, w1, b1, w2, b2)
    assert y.shape == (B, S, OUT1)
    assert jnp.allclose(y, y_ref, atol=1e-4, rtol=1e-4)

    # 2) Ragged everything: M=18 rows (partial tail row tile), hidden=320 split
    #    into masked 128-wide hidden tiles, out=96 padded to 128 lanes + sliced.
    IN2, HID2, OUT2 = 128, 320, 96
    x2 = jax.random.normal(kq, (2, 9, IN2), jnp.float32)
    w1b, b1b, w2b, b2b = init_mlp_params(kp, IN2, HID2, OUT2)
    y2 = jax.block_until_ready(
        mlp_pallas_torch_layout(x2, w1b, b1b, w2b, b2b,
                                row_tile=8, hidden_tile=128))
    y2_ref = _mlp_reference(x2, w1b, b1b, w2b, b2b)
    assert y2.shape == (2, 9, OUT2)
    assert jnp.allclose(y2, y2_ref, atol=1e-4, rtol=1e-4)

    print("KERNEL_OK")
</pallas_src>

<mosaic_0001>
module attributes {stable_mosaic.version = 11 : i64} {
  func.func @kernel(%arg0: i32, %arg1: i32, %arg2: memref<16x128xf32, #tpu.memory_space<vmem>>, %arg3: memref<128x256xf32, #tpu.memory_space<vmem>>, %arg4: memref<1x256xf32, #tpu.memory_space<vmem>>, %arg5: memref<256x128xf32, #tpu.memory_space<vmem>>, %arg6: memref<1x128xf32, #tpu.memory_space<vmem>>, %arg7: memref<16x128xf32, #tpu.memory_space<vmem>>, %arg8: memref<16x128xf32, #tpu.memory_space<vmem>>) attributes {dimension_semantics = [#tpu.dimension_semantics<parallel>, #tpu.dimension_semantics<arbitrary>], iteration_bounds = array<i64: 1, 1>, scalar_prefetch = 0 : i64, scratch_operands = 1 : i64, tpu.core_type = #tpu.core_type<tc>, window_params = [{transform_indices = @transform_0, window_bounds = array<i64: 16, 128>}, {transform_indices = @transform_1, window_bounds = array<i64: 128, 256>}, {transform_indices = @transform_2, window_bounds = array<i64: 1, 256>}, {transform_indices = @transform_3, window_bounds = array<i64: 256, 128>}, {pipeline_mode = #tpu.pipeline_mode<synchronous>, transform_indices = @transform_4, window_bounds = array<i64: 1, 128>}, {transform_indices = @transform_5, window_bounds = array<i64: 16, 128>}]} {
    %c0_i32 = arith.constant 0 : i32
    %0 = arith.cmpi eq, %arg1, %c0_i32 : i32
    %1 = arith.extui %0 : i1 to i32
    %c0_i32_0 = arith.constant 0 : i32
    %2 = arith.cmpi ne, %1, %c0_i32_0 : i32
    scf.if %2 {
      %cst_18 = arith.constant 0.000000e+00 : f32
      %25 = vector.broadcast %cst_18 : f32 to vector<16x128xf32>
      %c0_19 = arith.constant 0 : index
      %c0_20 = arith.constant 0 : index
      %26 = vector.load %arg8[%c0_19, %c0_20] : memref<16x128xf32, #tpu.memory_space<vmem>>, vector<16x128xf32>
      tpu.vector_store %arg8[%c0_19, %c0_20], %25 {strides = array<i32>} : memref<16x128xf32, #tpu.memory_space<vmem>>, vector<16x128xf32>,
    } else {
    }
    %c0 = arith.constant 0 : index
    %c0_1 = arith.constant 0 : index
    %3 = vector.load %arg2[%c0, %c0_1] : memref<16x128xf32, #tpu.memory_space<vmem>>, vector<16x128xf32>
    %c0_2 = arith.constant 0 : index
    %c0_3 = arith.constant 0 : index
    %4 = vector.load %arg3[%c0_2, %c0_3] : memref<128x256xf32, #tpu.memory_space<vmem>>, vector<128x256xf32>
    %cst = arith.constant dense<0.000000e+00> : vector<16x256xf32>
    %5 = tpu.matmul %3, %4, %cst {dimension_numbers = #tpu.dot_dimension_numbers<[1], [0], [0], [1], [0, 0, 1, 1], [], []>} : vector<16x128xf32>, vector<128x256xf32>, vector<16x256xf32> -> vector<16x256xf32>
    %c0_4 = arith.constant 0 : index
    %c0_5 = arith.constant 0 : index
    %6 = vector.load %arg4[%c0_4, %c0_5] : memref<1x256xf32, #tpu.memory_space<vmem>>, vector<1x256xf32>
    %7 = vector.broadcast %6 : vector<1x256xf32> to vector<16x256xf32>
    %8 = arith.addf %5, %7 : vector<16x256xf32>
    %cst_6 = arith.constant 5.000000e-01 : f32
    %9 = vector.broadcast %cst_6 : f32 to vector<16x256xf32>
    %10 = arith.mulf %9, %8 : vector<16x256xf32>
    %cst_7 = arith.constant 0.707106769 : f32
    %11 = vector.broadcast %cst_7 : f32 to vector<16x256xf32>
    %12 = arith.mulf %8, %11 : vector<16x256xf32>
    %13 = math.erf %12 : vector<16x256xf32>
    %cst_8 = arith.constant 1.000000e+00 : f32
    %14 = vector.broadcast %cst_8 : f32 to vector<16x256xf32>
    %15 = arith.addf %14, %13 : vector<16x256xf32>
    %16 = arith.mulf %10, %15 : vector<16x256xf32>
    %c0_9 = arith.constant 0 : index
    %c0_10 = arith.constant 0 : index
    %17 = vector.load %arg5[%c0_9, %c0_10] : memref<256x128xf32, #tpu.memory_space<vmem>>, vector<256x128xf32>
    %c0_11 = arith.constant 0 : index
    %c0_12 = arith.constant 0 : index
    %18 = vector.load %arg8[%c0_11, %c0_12] : memref<16x128xf32, #tpu.memory_space<vmem>>, vector<16x128xf32>
    %cst_13 = arith.constant dense<0.000000e+00> : vector<16x128xf32>
    %19 = tpu.matmul %16, %17, %cst_13 {dimension_numbers = #tpu.dot_dimension_numbers<[1], [0], [0], [1], [0, 0, 1, 1], [], []>} : vector<16x256xf32>, vector<256x128xf32>, vector<16x128xf32> -> vector<16x128xf32>
    %20 = arith.addf %18, %19 : vector<16x128xf32>
    %c0_14 = arith.constant 0 : index
    %c0_15 = arith.constant 0 : index
    %21 = vector.load %arg8[%c0_14, %c0_15] : memref<16x128xf32, #tpu.memory_space<vmem>>, vector<16x128xf32>
    tpu.vector_store %arg8[%c0_14, %c0_15], %20 {strides = array<i32>} : memref<16x128xf32, #tpu.memory_space<vmem>>, vector<16x128xf32>,
    %c0_i32_16 = arith.constant 0 : i32
    %22 = arith.cmpi eq, %arg1, %c0_i32_16 : i32
    %23 = arith.extui %22 : i1 to i32
    %c0_i32_17 = arith.constant 0 : i32
    %24 = arith.cmpi ne, %23, %c0_i32_17 : i32
    scf.if %24 {
      %c0_18 = arith.constant 0 : index
      %c0_19 = arith.constant 0 : index
      %25 = vector.load %arg8[%c0_18, %c0_19] : memref<16x128xf32, #tpu.memory_space<vmem>>, vector<16x128xf32>
      %c0_20 = arith.constant 0 : index
      %c0_21 = arith.constant 0 : index
      %26 = vector.load %arg6[%c0_20, %c0_21] : memref<1x128xf32, #tpu.memory_space<vmem>>, vector<1x128xf32>
      %27 = vector.broadcast %26 : vector<1x128xf32> to vector<16x128xf32>
      %28 = arith.addf %25, %27 : vector<16x128xf32>
      %c0_22 = arith.constant 0 : index
      %c0_23 = arith.constant 0 : index
      %29 = vector.load %arg7[%c0_22, %c0_23] : memref<16x128xf32, #tpu.memory_space<vmem>>, vector<16x128xf32>
      tpu.vector_store %arg7[%c0_22, %c0_23], %28 {strides = array<i32>} : memref<16x128xf32, #tpu.memory_space<vmem>>, vector<16x128xf32>,
    } else {
    }
    return
  }
  func.func @transform_0(%arg0: i32, %arg1: i32) -> (i32, i32) {
    %c0_i32 = arith.constant 0 : i32
    %c0_i32_0 = arith.constant 0 : i32
    return %arg0, %c0_i32 : i32, i32
  }
  func.func @transform_1(%arg0: i32, %arg1: i32) -> (i32, i32) {
    %c0_i32 = arith.constant 0 : i32
    %c0_i32_0 = arith.constant 0 : i32
    return %c0_i32, %arg1 : i32, i32
  }
  func.func @transform_2(%arg0: i32, %arg1: i32) -> (i32, i32) {
    %c0_i32 = arith.constant 0 : i32
    %c0_i32_0 = arith.constant 0 : i32
    return %c0_i32, %arg1 : i32, i32
  }
  func.func @transform_3(%arg0: i32, %arg1: i32) -> (i32, i32) {
    %c0_i32 = arith.constant 0 : i32
    %c0_i32_0 = arith.constant 0 : i32
    return %arg1, %c0_i32 : i32, i32
  }
  func.func @transform_4(%arg0: i32, %arg1: i32) -> (i32, i32) {
    %c0_i32 = arith.constant 0 : i32
    %c0_i32_0 = arith.constant 0 : i32
    %c0_i32_1 = arith.constant 0 : i32
    return %c0_i32, %c0_i32_0 : i32, i32
  }
  func.func @transform_5(%arg0: i32, %arg1: i32) -> (i32, i32) {
    %c0_i32 = arith.constant 0 : i32
    %c0_i32_0 = arith.constant 0 : i32
    return %arg0, %c0_i32 : i32, i32
  }
}

</mosaic_0001>

<bundles_post_ra>
// kernel: tpu_custom_call.1
= control target key start
LH: loop header
LB: loop body
LE: loop exit
PB: predicated region body
PF: predicated region fallthrough
CT: control target
= control target key end

     0   :  { %10 = vsyncpa [#allocation4], 0  ;;  %s782_s0 = inlined_call_operand.hbm [shape: f32[16,128], index: 0, kind: input, shape index: {}]   ;;  %s783_s1 = inlined_call_operand.hbm [shape: f32[128,256], index: 1, kind: input, shape index: {}]   ;;  %s784_s2 = inlined_call_operand.hbm [shape: f32[1,256], index: 2, kind: input, shape index: {}]   ;;  %s785_s3 = inlined_call_operand.hbm [shape: f32[256,128], index: 3, kind: input, shape index: {}]   ;;  %s786_s4 = inlined_call_operand.vmem [shape: f32[1,128], index: 4, kind: input, shape index: {}]   ;;  %s787_s5 = inlined_call_operand.hbm [shape: f32[16,128], index: 5, kind: output, shape index: {}]  }
   0x1   :  { %11 = vsyncpa [#allocation7], 0 }
   0x2   :  { %12 = vsyncpa [#allocation10], 0  ;;  %s31_s20 = sshll.u32 %s783_s1, 4  ;;  %s32_s20 = int_to_ptr.hbm [resolvable:$true] %s31_s20 }
   0x3   :  { %13 = vsyncpa [#allocation5], 0  ;;  %s618_s21 = smov [#allocation6]   ;;  %s18_s25 = sshll.u32 %s782_s0, 4  ;;  %s19_s25 = int_to_ptr.hbm [resolvable:$true] %s18_s25 }
   0x4   :  { %s33_s22 = sshll.u32 %s618_s21, 4  ;;  %s619_s26 = smov 256   ;;  %s34_s22 = int_to_ptr.vmem [resolvable:$true] %s33_s22 }
   0x5   :  { %s620_s27 = smov 16   ;;  %s621_s28 = smov [#allocation3]  }
   0x6   :  { %39 = dma.hbm_to_vmem [thread:$0]  %s32_s20, 4096, %s34_s22, [#allocation7], %s619_s26, %s619_s26, %s620_s27  }
   0x7   :  { %s20_s29 = sshll.u32 %s621_s28, 4  ;;  %s622_s30 = smov 128   ;;  %s21_s29 = int_to_ptr.vmem [resolvable:$true] %s20_s29 }
   0x8   :  { %s623_s6 = smov 8   ;;  %s45_s8 = sshll.u32 %s784_s2, 4  ;;  %s46_s8 = int_to_ptr.hbm [resolvable:$true] %s45_s8 }
   0x9   :  { %26 = dma.hbm_to_vmem [thread:$0]  %s19_s25, 256, %s21_s29, [#allocation4], %s622_s30, %s622_s30, %s623_s6  }
   0xa   :  { %s624_s9 = smov [#allocation8]   ;;  %s55_s12 = sshll.u32 %s785_s3, 4  ;;  %s56_s12 = int_to_ptr.hbm [resolvable:$true] %s55_s12 }
   0xb   :  { %s47_s0 = sshll.u32 %s624_s9, 4  ;;  %s625_s13 = smov [#allocation9]   ;;  %s48_s0 = int_to_ptr.vmem [resolvable:$true] %s47_s0 }
   0xc   :  { %50 = dma.hbm_to_vmem [thread:$0]  %s46_s8, 32, %s48_s0, [#allocation7]  }
   0xd   :  { %s57_s14 = sshll.u32 %s625_s13, 4  ;;  %s58_s14 = int_to_ptr.vmem [resolvable:$true] %s57_s14 }
   0xe   :  { %63 = dma.hbm_to_vmem [thread:$0]  %s56_s12, 4096, %s58_s14, [#allocation10], %s622_s30, %s622_s30, %s623_s6  }
   0xf   :  { %610 = dma.done.wait [#allocation4], 256  }
  0x10   :  { %611 = vsyncadd [#allocation4], 4294967040 }
  0x11   :  { %612 = dma.done.wait [#allocation7], 4128  }
  0x12   :  { %613 = vsyncadd [#allocation7], 4294963168 }
  0x13   :  { %614 = dma.done.wait [#allocation10], 4096  }
  0x14   :  { %615 = vsyncadd [#allocation10], 4294963200  ;;  %v120_v0 = vld [vmem:[#allocation6 + $0xf0] sm:$0xff]  ;;  %v121_v1 = vld [vmem:[#allocation6 + $0xf8] sm:$0xff]  ;;  %s626_s15 = smov [#allocation11]   ;;  %s453_s19 = sshll.u32 %s787_s5, 4  ;;  %s454_s19 = int_to_ptr.hbm [resolvable:$true] %s453_s19 }
  0x15   :  { %v118_v2 = vld [vmem:[#allocation6 + $0xe0] sm:$0xff]  ;;  %128 = vmatpush.msra.mxu0 %v120_v0  ;;  %151 = vmatpush.msra.mxu1 %v121_v1  ;;  %v119_v3 = vld [vmem:[#allocation6 + $0xe8] sm:$0xff]  ;;  %v116_v4 = vld [vmem:[#allocation6 + $0xd0] sm:$0xff]  ;;  %s451_s16 = sshll.u32 %s626_s15, 4  ;;  %s452_s16 = int_to_ptr.vmem [resolvable:$true] %s451_s16 }
  0x16   :  { %v117_v5 = vld [vmem:[#allocation6 + $0xd8] sm:$0xff]  ;;  %v114_v6 = vld [vmem:[#allocation6 + $0xc0] sm:$0xff]  ;;  %v115_v7 = vld [vmem:[#allocation6 + $0xc8] sm:$0xff] }
  0x17   :  { %129 = vmatpush.msra.mxu0 %v118_v2  ;;  %152 = vmatpush.msra.mxu1 %v119_v3  ;;  %v112_v8 = vld [vmem:[#allocation6 + $0xb0] sm:$0xff]  ;;  %v113_v9 = vld [vmem:[#allocation6 + $0xb8] sm:$0xff]  ;;  %v110_v10 = vld [vmem:[#allocation6 + $0xa0] sm:$0xff] }
  0x18   :  { %v111_v11 = vld [vmem:[#allocation6 + $0xa8] sm:$0xff]  ;;  %v108_v12 = vld [vmem:[#allocation6 + $0x90] sm:$0xff]  ;;  %v109_v13 = vld [vmem:[#allocation6 + $0x98] sm:$0xff] }
  0x19   :  { %130 = vmatpush.msra.mxu0 %v116_v4  ;;  %153 = vmatpush.msra.mxu1 %v117_v5  ;;  %v106_v14 = vld [vmem:[#allocation6 + $0x80] sm:$0xff]  ;;  %v107_v15 = vld [vmem:[#allocation6 + $0x88] sm:$0xff]  ;;  %v104_v16 = vld [vmem:[#allocation6 + $0x70] sm:$0xff] }
  0x1a   :  { %v105_v17 = vld [vmem:[#allocation6 + $0x78] sm:$0xff]  ;;  %v102_v18 = vld [vmem:[#allocation6 + $0x60] sm:$0xff]  ;;  %v103_v19 = vld [vmem:[#allocation6 + $0x68] sm:$0xff] }
  0x1b   :  { %131 = vmatpush.msra.mxu0 %v114_v6  ;;  %154 = vmatpush.msra.mxu1 %v115_v7  ;;  %v100_v20 = vld [vmem:[#allocation6 + $0x50] sm:$0xff]  ;;  %v101_v21 = vld [vmem:[#allocation6 + $0x58] sm:$0xff]  ;;  %v98_v22 = vld [vmem:[#allocation6 + $0x40] sm:$0xff] }
  0x1c   :  { %v99_v23 = vld [vmem:[#allocation6 + $0x48] sm:$0xff]  ;;  %v96_v24 = vld [vmem:[#allocation6 + $0x30] sm:$0xff]  ;;  %v97_v25 = vld [vmem:[#allocation6 + $0x38] sm:$0xff] }
  0x1d   :  { %132 = vmatpush.msra.mxu0 %v112_v8  ;;  %155 = vmatpush.msra.mxu1 %v113_v9  ;;  %v94_v26 = vld [vmem:[#allocation6 + $0x20] sm:$0xff]  ;;  %v95_v27 = vld [vmem:[#allocation6 + $0x28] sm:$0xff]  ;;  %v92_v28 = vld [vmem:[#allocation6 + $0x10] sm:$0xff] }
  0x1e   :  { %v93_v29 = vld [vmem:[#allocation6 + $0x18] sm:$0xff]  ;;  %v90_v30 = vld [vmem:[#allocation6] sm:$0xff]  ;;  %v91_v31 = vld [vmem:[#allocation6 + $0x8] sm:$0xff] }
  0x1f   :  { %133 = vmatpush.msra.mxu0 %v110_v10  ;;  %156 = vmatpush.msra.mxu1 %v111_v11  ;;  %v88_v32 = vld [vmem:[#allocation3] sm:$0xff]  ;;  %v89_v33 = vld [vmem:[#allocation3 + $0x8] sm:$0xff]  ;;  %v122_v38 = vld [vmem:[#allocation8] sm:$0x3] }
  0x20   :  { %v365_v34 = vld [vmem:[#allocation9 + $0x78] sm:$0xff]  ;;  %v364_v36 = vld [vmem:[#allocation9 + $0x70] sm:$0xff]  ;;  %v363_v39 = vld [vmem:[#allocation9 + $0x68] sm:$0xff]  ;;  %v124_v41 = vperm.slane %v122_v38, 0  ;;  %v125_v42 = vperm.slane %v122_v38, 1 }
  0x21   :  { %134 = vmatpush.msra.mxu0 %v108_v12  ;;  %157 = vmatpush.msra.mxu1 %v109_v13  ;;  %v381_v35 = vld [vmem:[#allocation9 + $0xf8] sm:$0xff]  ;;  %v380_v37 = vld [vmem:[#allocation9 + $0xf0] sm:$0xff]  ;;  %v379_v40 = vld [vmem:[#allocation9 + $0xe8] sm:$0xff] }
  0x22   :  { %384 = vmatpush.msra.mxu2 %v365_v34  ;;  %407 = vmatpush.msra.mxu3 %v381_v35  ;;  %v362_v43 = vld [vmem:[#allocation9 + $0x60] sm:$0xff]  ;;  %v361_v45 = vld [vmem:[#allocation9 + $0x58] sm:$0xff]  ;;  %v360_v51 = vld [vmem:[#allocation9 + $0x50] sm:$0xff] }
  0x23   :  { %135 = vmatpush.msra.mxu0 %v106_v14  ;;  %158 = vmatpush.msra.mxu1 %v107_v15  ;;  %v378_v44 = vld [vmem:[#allocation9 + $0xe0] sm:$0xff]  ;;  %v377_v46 = vld [vmem:[#allocation9 + $0xd8] sm:$0xff]  ;;  %v376_v52 = vld [vmem:[#allocation9 + $0xd0] sm:$0xff] }
  0x24   :  { %385 = vmatpush.msra.mxu2 %v364_v36  ;;  %408 = vmatpush.msra.mxu3 %v380_v37  ;;  %v359_v55 = vld [vmem:[#allocation9 + $0x48] sm:$0xff]  ;;  %v358_v59 = vld [vmem:[#allocation9 + $0x40] sm:$0xff]  ;;  %v357_v61 = vld [vmem:[#allocation9 + $0x38] sm:$0xff] }
  0x25   :  { %136 = vmatpush.msra.mxu0 %v104_v16  ;;  %159 = vmatpush.msra.mxu1 %v105_v17  ;;  %v375_v56 = vld [vmem:[#allocation9 + $0xc8] sm:$0xff]  ;;  %v374_v60 = vld [vmem:[#allocation9 + $0xc0] sm:$0xff]  ;;  %v373_v62 = vld [vmem:[#allocation9 + $0xb8] sm:$0xff] }
  0x26   :  { %386 = vmatpush.msra.mxu2 %v363_v39  ;;  %409 = vmatpush.msra.mxu3 %v379_v40  ;;  %v356_v3 = vld [vmem:[#allocation9 + $0x30] sm:$0xff]  ;;  %v355_v9 = vld [vmem:[#allocation9 + $0x28] sm:$0xff]  ;;  %v354_v16 = vld [vmem:[#allocation9 + $0x20] sm:$0xff] }
  0x27   :  { %137 = vmatpush.msra.mxu0 %v102_v18  ;;  %160 = vmatpush.msra.mxu1 %v103_v19  ;;  %v372_v4 = vld [vmem:[#allocation9 + $0xb0] sm:$0xff]  ;;  %v371_v10 = vld [vmem:[#allocation9 + $0xa8] sm:$0xff]  ;;  %v370_v17 = vld [vmem:[#allocation9 + $0xa0] sm:$0xff] }
  0x28   :  { %387 = vmatpush.msra.mxu2 %v362_v43  ;;  %410 = vmatpush.msra.mxu3 %v378_v44  ;;  %v351_v38 = vld [vmem:[#allocation9 + $0x8] sm:$0xff] }
  0x29   :  { %138 = vmatpush.msra.mxu0 %v100_v20  ;;  %161 = vmatpush.msra.mxu1 %v101_v21  ;;  %v367_v39 = vld [vmem:[#allocation9 + $0x88] sm:$0xff] }
  0x2a   :  { %388 = vmatpush.msra.mxu2 %v361_v45  ;;  %411 = vmatpush.msra.mxu3 %v377_v46  ;;  %v350_v46 = vld [vmem:[#allocation9] sm:$0xff] }
  0x2b   :  { %139 = vmatpush.msra.mxu0 %v98_v22  ;;  %162 = vmatpush.msra.mxu1 %v99_v23 }
  0x2c   :  { %389 = vmatpush.msra.mxu2 %v360_v51  ;;  %412 = vmatpush.msra.mxu3 %v376_v52 }
  0x2d   :  { %140 = vmatpush.msra.mxu0 %v96_v24  ;;  %163 = vmatpush.msra.mxu1 %v97_v25  ;;  %v353_v24 = vld [vmem:[#allocation9 + $0x18] sm:$0xff] }
  0x2e   :  { %390 = vmatpush.msra.mxu2 %v359_v55  ;;  %413 = vmatpush.msra.mxu3 %v375_v56  ;;  %v369_v25 = vld [vmem:[#allocation9 + $0x98] sm:$0xff] }
  0x2f   :  { %141 = vmatpush.msra.mxu0 %v94_v26  ;;  %164 = vmatpush.msra.mxu1 %v95_v27 }
  0x30   :  { %391 = vmatpush.msra.mxu2 %v358_v59  ;;  %414 = vmatpush.msra.mxu3 %v374_v60 }
  0x31   :  { %142 = vmatpush.msra.mxu0 %v92_v28  ;;  %165 = vmatpush.msra.mxu1 %v93_v29 }
  0x32   :  { %392 = vmatpush.msra.mxu2 %v357_v61  ;;  %415 = vmatpush.msra.mxu3 %v373_v62 }
  0x33   :  { %143 = vmatpush.msra.mxu0 %v90_v30  ;;  %166 = vmatpush.msra.mxu1 %v91_v31 }
  0x34   :  { %144 = vmatmul.f32.vlgmr.msra.gmra.mxu0 %v88_v32  ;;  %167 = vmatmul.f32.vlgmr.msra.gmra.mxu1 %v88_v32  ;;  %v352_v32 = vld [vmem:[#allocation9 + $0x10] sm:$0xff] }
  0x35   :  { %393 = vmatpush.msra.mxu2 %v356_v3  ;;  %416 = vmatpush.msra.mxu3 %v372_v4 }
  0x37   :  { %394 = vmatpush.msra.mxu2 %v355_v9  ;;  %417 = vmatpush.msra.mxu3 %v371_v10 }
  0x39   :  { %395 = vmatpush.msra.mxu2 %v354_v16  ;;  %418 = vmatpush.msra.mxu3 %v370_v17 }
  0x3b   :  { %396 = vmatpush.msra.mxu2 %v353_v24  ;;  %419 = vmatpush.msra.mxu3 %v369_v25 }
  0x3c   :  { %147 = vmatmul.f32.gmra.mxu0 %v89_v33  ;;  %170 = vmatmul.f32.gmra.mxu1 %v89_v33  ;;  %v368_v33 = vld [vmem:[#allocation9 + $0x90] sm:$0xff] }
  0x3d   :  { %397 = vmatpush.msra.mxu2 %v352_v32  ;;  %420 = vmatpush.msra.mxu3 %v368_v33 }
  0x3f   :  { %398 = vmatpush.msra.mxu2 %v351_v38  ;;  %421 = vmatpush.msra.mxu3 %v367_v39 }
  0x41   :  { %399 = vmatpush.msra.mxu2 %v350_v46 }
  0xb1   :  { %v145_v47 = vpop.f32.mrf.mxu0  ;;  %v168_v48 = vpop.f32.mrf.mxu1 }
  0xb2   :  { %v675_v49 = vadd.f32 %v145_v47, %v124_v41  ;;  %v677_v50 = vadd.f32 %v168_v48, %v125_v42  ;;  %v366_v47 = vld [vmem:[#allocation9 + $0x80] sm:$0xff] }
  0xb3   :  { %422 = vmatpush.msra.mxu3 %v366_v47 }
  0xb4   :  { %v680_v53 = vmul.f32 0.70710677, %v675_v49  ;;  %v683_v54 = vmul.f32 0.70710677, %v677_v50 }
  0xb6   :  { %v182_v57 = vmul.f32 %v680_v53, %v680_v53  ;;  %v222_v58 = vmul.f32 %v683_v54, %v683_v54 }
  0xb8   :  { %v689_v63 = vmin.f32 %v182_v57, 16.0  ;;  %v691_v0 = vmin.f32 %v222_v58, 16.0 }
  0xb9   :  { %v148_v1 = vpop.f32.mrf.mxu0  ;;  %v171_v2 = vpop.f32.mrf.mxu1 }
  0xba   :  { %v184_v5 = vmul.f32 2.1237322e-06, %v689_v63  ;;  %v224_v6 = vmul.f32 2.1237322e-06, %v691_v0  ;;  %v695_v7 = vadd.f32 %v148_v1, %v124_v41  ;;  %v697_v8 = vadd.f32 %v171_v2, %v125_v42 }
  0xbb   :  { %v195_v11 = vmul.f32 3.8918573e-05, %v689_v63  ;;  %v235_v21 = vmul.f32 3.8918573e-05, %v691_v0 }
  0xbc   :  { %v185_v12 = vadd.f32 0.00028619796, %v184_v5  ;;  %v225_v13 = vadd.f32 0.00028619796, %v224_v6  ;;  %v701_v14 = vmul.f32 0.70710677, %v695_v7 }
  0xbd   :  { %v704_v15 = vmul.f32 0.70710677, %v697_v8  ;;  %v196_v20 = vadd.f32 0.001143296, %v195_v11  ;;  %v236_v29 = vadd.f32 0.001143296, %v235_v21 }
  0xbe   :  { %v186_v18 = vmul.f32 %v185_v12, %v689_v63  ;;  %v226_v19 = vmul.f32 %v225_v13, %v691_v0  ;;  %v262_v22 = vmul.f32 %v701_v14, %v701_v14 }
  0xbf   :  { %v302_v23 = vmul.f32 %v704_v15, %v704_v15  ;;  %v197_v28 = vmul.f32 %v196_v20, %v689_v63  ;;  %v237_v36 = vmul.f32 %v236_v29, %v691_v0 }
  0xc0   :  { %v187_v26 = vadd.f32 0.0036580483, %v186_v18  ;;  %v227_v27 = vadd.f32 0.0036580483, %v226_v19  ;;  %v714_v30 = vmin.f32 %v262_v22, 16.0 }
  0xc1   :  { %v716_v31 = vmin.f32 %v302_v23, 16.0  ;;  %v198_v35 = vadd.f32 0.014752088, %v197_v28  ;;  %v238_v44 = vadd.f32 0.014752088, %v237_v36 }
  0xc2   :  { %v188_v34 = vmul.f32 %v187_v26, %v689_v63  ;;  %v264_v37 = vmul.f32 2.1237322e-06, %v714_v30  ;;  %v275_v40 = vmul.f32 3.8918573e-05, %v714_v30  ;;  %v228_v41 = vmul.f32 %v227_v27, %v691_v0 }
  0xc3   :  { %v304_v42 = vmul.f32 2.1237322e-06, %v716_v31  ;;  %v199_v43 = vmul.f32 %v198_v35, %v689_v63  ;;  %v239_v55 = vmul.f32 %v238_v44, %v691_v0  ;;  %v315_v58 = vmul.f32 3.8918573e-05, %v716_v31 }
  0xc4   :  { %v265_v45 = vadd.f32 0.00028619796, %v264_v37  ;;  %v276_v48 = vadd.f32 0.001143296, %v275_v40  ;;  %v189_v51 = vadd.f32 0.05243302, %v188_v34 }
  0xc5   :  { %v200_v52 = vadd.f32 0.112945676, %v199_v43  ;;  %v229_v59 = vadd.f32 0.05243302, %v228_v41  ;;  %v305_v60 = vadd.f32 0.00028619796, %v304_v42 }
  0xc6   :  { %v266_v56 = vmul.f32 %v265_v45, %v714_v30  ;;  %v277_v57 = vmul.f32 %v276_v48, %v714_v30  ;;  %v240_v62 = vadd.f32 0.112945676, %v239_v55  ;;  %v190_v3 = vmul.f32 %v189_v51, %v689_v63 }
  0xc7   :  { %v201_v61 = vmul.f32 %v200_v52, %v689_v63  ;;  %v316_v9 = vadd.f32 0.001143296, %v315_v58  ;;  %v230_v10 = vmul.f32 %v229_v59, %v691_v0  ;;  %v306_v11 = vmul.f32 %v305_v60, %v716_v31 }
  0xc8   :  { %v267_v1 = vadd.f32 0.0036580483, %v266_v56  ;;  %v278_v2 = vadd.f32 0.014752088, %v277_v57  ;;  %v241_v5 = vmul.f32 %v240_v62, %v691_v0  ;;  %v191_v19 = vadd.f32 0.18741608, %v190_v3 }
  0xc9   :  { %v202_v4 = vadd.f32 0.4994258, %v201_v61  ;;  %v317_v18 = vmul.f32 %v316_v9, %v716_v31  ;;  %v231_v24 = vadd.f32 0.18741608, %v230_v10  ;;  %v307_v25 = vadd.f32 0.0036580483, %v306_v11 }
  0xca   :  { %v279_v6 = vmul.f32 %v278_v2, %v714_v30  ;;  %v242_v13 = vadd.f32 0.4994258, %v241_v5  ;;  %v268_v16 = vmul.f32 %v267_v1, %v714_v30  ;;  %v192_v29 = vmul.f32 %v191_v19, %v689_v63 }
  0xcb   :  { %v203_v12 = vmul.f32 %v202_v4, %v689_v63  ;;  %v318_v23 = vadd.f32 0.014752088, %v317_v18  ;;  %v232_v33 = vmul.f32 %v231_v24, %v691_v0  ;;  %v308_v34 = vmul.f32 %v307_v25, %v716_v31 }
  0xcc   :  { %v280_v17 = vadd.f32 0.112945676, %v279_v6  ;;  %v243_v21 = vmul.f32 %v242_v13, %v691_v0  ;;  %v269_v26 = vadd.f32 0.05243302, %v268_v16  ;;  %v193_v39 = vadd.f32 1.1283791, %v192_v29 }
  0xcd   :  { %v204_v20 = vadd.f32 1.0, %v203_v12  ;;  %v319_v28 = vmul.f32 %v318_v23, %v716_v31  ;;  %v233_v43 = vadd.f32 1.1283791, %v232_v33  ;;  %v309_v63 = vadd.f32 0.05243302, %v308_v34 }
  0xce   :  { %v281_v22 = vmul.f32 %v280_v17, %v714_v30  ;;  %v244_v27 = vadd.f32 1.0, %v243_v21  ;;  %v270_v37 = vmul.f32 %v269_v26, %v714_v30  ;;  %v194_v47 = vmul.f32 %v193_v39, %v680_v53 }
  0xcf   :  { %482 = vrcp.f32 %v204_v20  ;;  %v320_v36 = vadd.f32 0.112945676, %v319_v28  ;;  %v216_v48 = vand.u32 2147483648, %v204_v20  ;;  %v214_v55 = vand.u32 2147483647, %v204_v20 }
  0xd0   :  { %v282_v32 = vadd.f32 0.4994258, %v281_v22  ;;  %484 = vrcp.f32 %v244_v27  ;;  %v271_v0 = vadd.f32 0.18741608, %v270_v37  ;;  %v234_v57 = vmul.f32 %v233_v43, %v683_v54 }
  0xd1   :  { %v321_v41 = vmul.f32 %v320_v36, %v716_v31  ;;  %v310_v58 = vmul.f32 %v309_v63, %v716_v31  ;;  %vm210_vm1 = vweird.f32 %v204_v20  ;;  %v256_v62 = vand.u32 2147483648, %v244_v27 }
  0xd2   :  { %v283_v35 = vmul.f32 %v282_v32, %v714_v30  ;;  %v272_v60 = vmul.f32 %v271_v0, %v714_v30  ;;  %v217_v2 = vor.u32 1.1754944e-38, %v216_v48  ;;  %v254_v4 = vand.u32 2147483647, %v244_v27 }
  0xd3   :  { %v322_v46 = vadd.f32 0.4994258, %v321_v41  ;;  %vm215_vm4 = vcmp.eq.f32.partialorder %v214_v55, 8.507059e+37  ;;  %v311_v6 = vadd.f32 0.18741608, %v310_v58  ;;  %vm250_vm5 = vweird.f32 %v244_v27 }
  0xd4   :  { %v746_v40 = vadd.f32 1.0, %v283_v35  ;;  %v273_v30 = vadd.f32 1.1283791, %v272_v60  ;;  %v257_v12 = vor.u32 1.1754944e-38, %v256_v62  ;;  %vm255_vm7 = vcmp.eq.f32.partialorder %v254_v4, 8.507059e+37 }
  0xd5   :  { %v483_v38 = vpop.eup %482  ;;  %v323_v56 = vmul.f32 %v322_v46, %v716_v31  ;;  %v174_v22 = vmul.f32 0.5, %v675_v49  ;;  %v312_v25 = vmul.f32 %v311_v6, %v716_v31  ;;  %v175_v49 = vmul.f32 0.5, %v677_v50 }
  0xd6   :  { %v206_v42 = vmul.f32 %v483_v38, %v204_v20  ;;  %486 = vrcp.f32 %v746_v40  ;;  %v485_v44 = vpop.eup %484  ;;  %vm211_vm0 = vweird.f32 %v483_v38  ;;  %v294_v17 = vand.u32 2147483647, %v746_v40 }
  0xd7   :  { %v246_v51 = vmul.f32 %v485_v44, %v244_v27  ;;  %v755_v1 = vadd.f32 1.0, %v323_v56  ;;  %vm212_vm2 = vmor %vm210_vm1, %vm211_vm0  ;;  %vm251_vm3 = vweird.f32 %v485_v44  ;;  %v296_v18 = vand.u32 2147483648, %v746_v40 }
  0xd8   :  { %v207_v45 = vsub.f32 1.0, %v206_v42  ;;  %vm252_vm6 = vmor %vm250_vm5, %vm251_vm3  ;;  %vm290_vm9 = vweird.f32 %v746_v40  ;;  %v274_v33 = vmul.f32 %v273_v30, %v701_v14  ;;  %vm295_vm11 = vcmp.eq.f32.partialorder %v294_v17, 8.507059e+37 }
  0xd9   :  { %v247_v59 = vsub.f32 1.0, %v246_v51  ;;  %488 = vrcp.f32 %v755_v1  ;;  %v297_v29 = vor.u32 1.1754944e-38, %v296_v18  ;;  %v313_v31 = vadd.f32 1.1283791, %v312_v25 }
  0xda   :  { %v208_v52 = vmul.f32 %v483_v38, %v207_v45  ;;  %v334_v43 = vand.u32 2147483647, %v755_v1  ;;  %vm330_vm13 = vweird.f32 %v755_v1  ;;  %v176_v50 = vmul.f32 0.5, %v695_v7  ;;  %v481_v7 = vld [vmem:[%s786_s4] ss:$0 sm:$0xff] }
  0xdb   :  { %v248_v3 = vmul.f32 %v485_v44, %v247_v59  ;;  %v314_v45 = vmul.f32 %v313_v31, %v704_v15  ;;  %v177_v55 = vmul.f32 0.5, %v697_v8 }
  0xdc   :  { %v209_v61 = vadd.f32 %v483_v38, %v208_v52  ;;  %v487_v53 = vpop.eup %486  ;;  %vm335_vm15 = vcmp.eq.f32.partialorder %v334_v43, 8.507059e+37 }
  0xdd   :  { %v286_v54 = vmul.f32 %v487_v53, %v746_v40  ;;  %v249_v10 = vadd.f32 %v485_v44, %v248_v3  ;;  %vm291_vm8 = vweird.f32 %v487_v53  ;;  %v336_v40 = vand.u32 2147483648, %v755_v1 }
  0xde   :  { %v213_v5 = vsel %vm212_vm2, %v483_v38, %v209_v61  ;;  %vm292_vm10 = vmor %vm290_vm9, %vm291_vm8 }
  0xdf   :  { %v218_v9 = vsel %vm215_vm4, %v217_v2, %v213_v5  ;;  %v287_v13 = vsub.f32 1.0, %v286_v54  ;;  %v253_v16 = vsel %vm252_vm6, %v485_v44, %v249_v10  ;;  %v489_v24 = vpop.eup %488  ;;  %v337_v0 = vor.u32 1.1754944e-38, %v336_v40 }
  0xe0   :  { %v219_v11 = vmul.f32 %v218_v9, %v194_v47  ;;  %v258_v20 = vsel %vm255_vm7, %v257_v12, %v253_v16  ;;  %v326_v32 = vmul.f32 %v489_v24, %v755_v1  ;;  %vm331_vm12 = vweird.f32 %v489_v24 }
  0xe1   :  { %v288_v21 = vmul.f32 %v487_v53, %v287_v13  ;;  %v259_v23 = vmul.f32 %v258_v20, %v234_v57  ;;  %vm332_vm14 = vmor %vm330_vm13, %vm331_vm12 }
  0xe2   :  { %v468_v19 = vclamps-f32 %v219_v11, 1.0  ;;  %v327_v38 = vsub.f32 1.0, %v326_v32 }
  0xe3   :  { %v289_v27 = vadd.f32 %v487_v53, %v288_v21  ;;  %v469_v28 = vclamps-f32 %v259_v23, 1.0 }
  0xe4   :  { %v342_v26 = vadd.f32 1.0, %v468_v19  ;;  %v328_v42 = vmul.f32 %v489_v24, %v327_v38 }
  0xe5   :  { %v293_v35 = vsel %vm292_vm10, %v487_v53, %v289_v27  ;;  %v343_v36 = vadd.f32 1.0, %v469_v28 }
  0xe6   :  { %v346_v34 = vmul.f32 %v342_v26, %v174_v22  ;;  %v298_v37 = vsel %vm295_vm11, %v297_v29, %v293_v35  ;;  %v329_v14 = vadd.f32 %v489_v24, %v328_v42 }
  0xe7   :  { %v299_v39 = vmul.f32 %v298_v37, %v274_v33  ;;  %v347_v41 = vmul.f32 %v343_v36, %v175_v49 }
  0xe8   :  { %400 = vmatmul.f32.vlgmr.msra.gmra.mxu2 %v346_v34  ;;  %v333_v46 = vsel %vm332_vm14, %v489_v24, %v329_v14 }
  0xe9   :  { %v470_v63 = vclamps-f32 %v299_v39, 1.0  ;;  %423 = vmatmul.f32.vlgmr.msra.gmra.mxu3 %v347_v41  ;;  %v338_v48 = vsel %vm335_vm15, %v337_v0, %v333_v46 }
  0xea   :  { %v339_v51 = vmul.f32 %v338_v48, %v314_v45 }
  0xeb   :  { %v344_v44 = vadd.f32 1.0, %v470_v63 }
  0xec   :  { %v471_v52 = vclamps-f32 %v339_v51, 1.0 }
  0xed   :  { %v348_v47 = vmul.f32 %v344_v44, %v176_v50 }
  0xee   :  { %v345_v56 = vadd.f32 1.0, %v471_v52 }
  0xf0   :  { %403 = vmatmul.f32.gmra.mxu2 %v348_v47  ;;  %v349_v57 = vmul.f32 %v345_v56, %v177_v55 }
  0xf2   :  { %426 = vmatmul.f32.gmra.mxu3 %v349_v57 }
 0x16b   :  { %v401_v58 = vpop.f32.mrf.mxu2 }
 0x16c   :  { %v424_v59 = vpop.f32.mrf.mxu3 }
 0x16d   :  { %v425_v60 = vadd.f32 %v424_v59, %v401_v58 }
 0x16f   :  { %v443_v15 = vadd.f32 %v481_v7, %v425_v60 }
 0x171   :  { %445 = vst [vmem:[#allocation11] sm:$0xff] %v443_v15 }
 0x173   :  { %v404_v61 = vpop.f32.mrf.mxu2 }
 0x175   :  { %v427_v62 = vpop.f32.mrf.mxu3 }
 0x176   :  { %v428_v8 = vadd.f32 %v427_v62, %v404_v61 }
 0x178   :  { %v444_v1 = vadd.f32 %v481_v7, %v428_v8 }
 0x17a   :  { %446 = vst [vmem:[#allocation11 + $0x8] sm:$0xff] %v444_v1 }
 0x17b   :  { %459 = dma.vmem_to_hbm [thread:$0]  %s452_s16, 256, %s454_s19, [#allocation5], %s622_s30, %s622_s30, %s623_s6  }
 0x17c   :  { %616 = dma.done.wait [#allocation5], 256  }
 0x17d   :  { %617 = vsyncadd [#allocation5], 4294967040 }
 0x17e   :  { %464 = vsyncpa [#allocation4], 1 }
 0x17f   :  { %465 = vsyncpa [#allocation7], 1 }
 0x180   :  { %466 = vsyncpa [#allocation10], 1 }
 0x181   :  { %467 = vsyncpa [#allocation5], 1 }

</bundles_post_ra>
